<compile_context>
chip_gen: v7x
topology: tpu7x:2x2x1
jax: 0.10.0
libtpu: 0.0.40
codegen_flags: <defaults>
</compile_context>

<pallas_src>
import jax
import jax.numpy as jnp
import numpy as np
from jax.experimental import pallas as pl
from jax.experimental.pallas import tpu as pltpu

EPS = 1e-5
NEG_SLOPE = 0.2


def _ceil_to(x, m):
    return ((x + m - 1) // m) * m


def _halo_off(W):
    # Interior offset inside the flat activation strip: must be >= W+1 so every
    # tap read stays in-bounds; rounded to 128 so the interior store is
    # lane-aligned (unmasked).
    return _ceil_to(W + 1, 128)


def _vmem_limit_bytes():
    try:
        cap = int(pltpu.get_tpu_info().vmem_capacity_bytes)
    except Exception:
        cap = 64 * 1024 * 1024            # conservative (v7x-sized) fallback
    return int(min(96 * 1024 * 1024, max(32 * 1024 * 1024, (cap * 3) // 4)))


def _images_per_step(N, c_max, P):
    # Batch images per grid step to amortize the ~0.35us per-step overhead and
    # widen the matmul lane dim, while (a) keeping >=2 grid steps so the batch
    # axis still shards across v7x's two TensorCores and (b) keeping the bf16
    # im2col scratch modest (v7x has only 64 MiB VMEM).
    budget = 8 * 1024 * 1024
    best = 1
    for b in range(1, N + 1):
        if N % b:
            continue
        if N // b < 2 and N > 1:
            continue
        if 9 * c_max * b * P * 2 > budget:
            continue
        best = b
    return best


def _fold_bn(stats_ref, gamma_ref, beta_ref, inv_n):
    """Combine per-step partial (sum, sum_sq) -> folded per-channel scale/shift."""
    tot = stats_ref[0]
    for g in range(1, stats_ref.shape[0]):
        tot = tot + stats_ref[g]
    mean = tot[:, 0:1] * inv_n
    var = tot[:, 1:2] * inv_n - mean * mean       # biased (training-mode) variance
    scale = gamma_ref[...] * jax.lax.rsqrt(var + EPS)
    shift = beta_ref[...] - mean * scale
    return scale, shift


def _tap_masks(H, W, P):
    """Per-tap validity masks implementing the 3x3 conv's zero padding, (1, P)."""
    lane = jax.lax.broadcasted_iota(jnp.int32, (1, P), 1)
    wq = lane % W
    masks = {}
    for r in (-1, 0, 1):
        for c in (-1, 0, 1):
            m = None
            if r == -1:
                m = lane >= W                     # row 0 would read row -1
            elif r == 1:
                m = lane < (H - 1) * W            # last row would read row H
            if c == -1:
                mc = wq != 0
                m = mc if m is None else jnp.logical_and(m, mc)
            elif c == 1:
                mc = wq != (W - 1)
                m = mc if m is None else jnp.logical_and(m, mc)
            masks[(r, c)] = m
    return masks


def _bn_lrelu_im2col(x_b, scale, shift, aext_ref, col_ref, masks, cin, P, W, off, b):
    """Fused BN(scale/shift)+LeakyReLU of one image, then 9 bf16 taps into col_ref.

    x_b:      (cin, P) activation (any float dtype), P = H*W on the lane axis
    aext_ref: VMEM (cin, P + 2*off) f32 flat strip (halos never read unmasked)
    col_ref:  VMEM (9*cin, B*P) bf16 im2col buffer; image b fills columns b*P:(b+1)*P
    """
    a = x_b.astype(jnp.float32) * scale + shift
    a = jnp.where(a > 0.0, a, NEG_SLOPE * a)
    aext_ref[:, off:off + P] = a                  # lane-aligned interior store
    t = 0
    for r in (-1, 0, 1):
        for c in (-1, 0, 1):
            start = off + r * W + c
            tap = aext_ref[:, start:start + P]
            m = masks[(r, c)]
            if m is not None:
                tap = jnp.where(m, tap, 0.0)      # out-of-image taps -> 0
            col_ref[t * cin:(t + 1) * cin, b * P:(b + 1) * P] = tap.astype(jnp.bfloat16)
            t += 1


def _make_stats_kernel(B, C):
    """Per-step partial BN statistics of the raw input: (sum, sum_sq) per channel."""
    def kernel(x_ref, stats_ref):
        s = jnp.zeros((C, 1), jnp.float32)
        ss = jnp.zeros((C, 1), jnp.float32)
        for b in range(B):
            xb = x_ref[b].astype(jnp.float32)
            s = s + jnp.sum(xb, axis=1, keepdims=True)
            ss = ss + jnp.sum(xb * xb, axis=1, keepdims=True)
        stats_ref[0, :, 0:1] = s
        stats_ref[0, :, 1:2] = ss
    return kernel


def _make_stage_kernel(H, W, P, B, n_total_pix, cin, cout, out_dtype):
    """In-kernel BN fold + LReLU + 3x3 conv (one im2col matmul) + output stats."""
    off = _halo_off(W)
    inv_n = 1.0 / float(n_total_pix)

    def kernel(x_ref, stats_ref, gamma_ref, beta_ref, w_ref,
               y_ref, stats_out_ref, aext_ref, col_ref):
        scale, shift = _fold_bn(stats_ref, gamma_ref, beta_ref, inv_n)
        masks = _tap_masks(H, W, P)
        for b in range(B):
            _bn_lrelu_im2col(x_ref[b], scale, shift, aext_ref, col_ref,
                             masks, cin, P, W, off, b)
        # (cout, 9*cin) bf16 @ (9*cin, B*P) bf16 -> f32, lane-dense output.
        y = jnp.dot(w_ref[...], col_ref[...], preferred_element_type=jnp.float32)
        stats_out_ref[0, :, 0:1] = jnp.sum(y, axis=1, keepdims=True)
        stats_out_ref[0, :, 1:2] = jnp.sum(y * y, axis=1, keepdims=True)
        y_cast = y.astype(out_dtype)
        for b in range(B):
            y_ref[b] = y_cast[:, b * P:(b + 1) * P]
    return kernel


def _make_final_kernel(H, W, P, B, n_total_pix, c_act):
    """BN fold + LReLU + 3x3 conv, with the 1x1 skip (+bias) folded in."""
    off = _halo_off(W)
    inv_n = 1.0 / float(n_total_pix)

    def kernel(x0_ref, a_ref, stats_ref, gamma_ref, beta_ref, w_ref, ws_ref, bs_ref,
               out_ref, aext_ref, col_ref):
        scale, shift = _fold_bn(stats_ref, gamma_ref, beta_ref, inv_n)
        masks = _tap_masks(H, W, P)
        for b in range(B):
            _bn_lrelu_im2col(a_ref[b], scale, shift, aext_ref, col_ref,
                             masks, c_act, P, W, off, b)
        y = jnp.dot(w_ref[...], col_ref[...], preferred_element_type=jnp.float32)
        for b in range(B):
            skip = jnp.dot(ws_ref[...], x0_ref[b].astype(jnp.bfloat16),
                           preferred_element_type=jnp.float32) + bs_ref[...]
            out_ref[b] = skip + y[:, b * P:(b + 1) * P]
    return kernel


def resblock_pallas(x_nchw, p):
    N, Cin, H, W = x_nchw.shape
    Cout = p['w1'].shape[-1]
    P = H * W
    Ci = _ceil_to(Cin, 8)         # channel pad -> 8-row-aligned (unmasked) stores
    Co = _ceil_to(Cout, 8)
    Ptot = float(N * P)

    # NCHW -> (N, C, H*W): free reshape, no transpose; zero-pad channels.
    x = x_nchw.reshape(N, Cin, P).astype(jnp.float32)
    if Ci != Cin:
        x = jnp.pad(x, ((0, 0), (0, Ci - Cin), (0, 0)))

    B = _images_per_step(N, max(Ci, Co), P)
    G = N // B
    off = _halo_off(W)

    cparams = pltpu.CompilerParams(dimension_semantics=("parallel",),
                                   vmem_limit_bytes=_vmem_limit_bytes())

    def cvec(v, c, cp):                         # (1,c) -> (cp,1) f32, zero-padded
        v = v.reshape(c, 1).astype(jnp.float32)
        return jnp.pad(v, ((0, cp - c), (0, 0))) if cp != c else v

    def wmat(w, ci, co, cip, cop):              # HWIO (3,3,ci,co) -> (cop, 9*cip) bf16
        w = jnp.pad(w, ((0, 0), (0, 0), (0, cip - ci), (0, cop - co)))
        return jnp.transpose(w.reshape(9 * cip, cop)).astype(jnp.bfloat16)

    # ---- Phase A for BN1: per-step partial batch statistics of x ----
    stats_x = pl.pallas_call(
        _make_stats_kernel(B, Ci),
        grid=(G,),
        in_specs=[pl.BlockSpec((B, Ci, P), lambda i: (i, 0, 0))],
        out_specs=pl.BlockSpec((1, Ci, 2), lambda i: (i, 0, 0)),
        out_shape=jax.ShapeDtypeStruct((G, Ci, 2), jnp.float32),
        compiler_params=cparams,
    )(x)

    def run_stage(act, stats, gamma, beta, wm, cin, cout):
        return pl.pallas_call(
            _make_stage_kernel(H, W, P, B, Ptot, cin, cout, jnp.bfloat16),
            grid=(G,),
            in_specs=[
                pl.BlockSpec((B, cin, P), lambda i: (i, 0, 0)),     # activation
                pl.BlockSpec((G, cin, 2), lambda i: (0, 0, 0)),     # batch stats
                pl.BlockSpec((cin, 1), lambda i: (0, 0)),           # gamma
                pl.BlockSpec((cin, 1), lambda i: (0, 0)),           # beta
                pl.BlockSpec((cout, 9 * cin), lambda i: (0, 0)),    # conv weight
            ],
            out_specs=[
                pl.BlockSpec((B, cout, P), lambda i: (i, 0, 0)),    # conv out (bf16)
                pl.BlockSpec((1, cout, 2), lambda i: (i, 0, 0)),    # partial stats
            ],
            out_shape=[
                jax.ShapeDtypeStruct((N, cout, P), jnp.bfloat16),
                jax.ShapeDtypeStruct((G, cout, 2), jnp.float32),
            ],
            scratch_shapes=[
                pltpu.VMEM((cin, P + 2 * off), jnp.float32),        # flat strip
                pltpu.VMEM((9 * cin, B * P), jnp.bfloat16),         # bf16 im2col
            ],
            compiler_params=cparams,
        )(act, stats, gamma, beta, wm)

    y1, st1 = run_stage(x, stats_x, cvec(p['g1'], Cin, Ci), cvec(p['b1'], Cin, Ci),
                        wmat(p['w1'], Cin, Cout, Ci, Co), Ci, Co)
    y2, st2 = run_stage(y1, st1, cvec(p['g2'], Cout, Co), cvec(p['b2'], Cout, Co),
                        wmat(p['w2'], Cout, Cout, Co, Co), Co, Co)

    wsm = jnp.transpose(jnp.pad(p['ws'], ((0, Ci - Cin), (0, Co - Cout)))
                        ).astype(jnp.bfloat16)                      # (Co, Ci)
    bsm = cvec(p['bs'], Cout, Co)                                   # (Co, 1)

    out = pl.pallas_call(
        _make_final_kernel(H, W, P, B, Ptot, Co),
        grid=(G,),
        in_specs=[
            pl.BlockSpec((B, Ci, P), lambda i: (i, 0, 0)),          # x (skip input)
            pl.BlockSpec((B, Co, P), lambda i: (i, 0, 0)),          # y2 (bf16)
            pl.BlockSpec((G, Co, 2), lambda i: (0, 0, 0)),          # stats of y2
            pl.BlockSpec((Co, 1), lambda i: (0, 0)),                # gamma3
            pl.BlockSpec((Co, 1), lambda i: (0, 0)),                # beta3
            pl.BlockSpec((Co, 9 * Co), lambda i: (0, 0)),           # w3
            pl.BlockSpec((Co, Ci), lambda i: (0, 0)),               # skip weight
            pl.BlockSpec((Co, 1), lambda i: (0, 0)),                # skip bias
        ],
        out_specs=pl.BlockSpec((B, Co, P), lambda i: (i, 0, 0)),
        out_shape=jax.ShapeDtypeStruct((N, Co, P), jnp.float32),
        scratch_shapes=[
            pltpu.VMEM((Co, P + 2 * off), jnp.float32),
            pltpu.VMEM((9 * Co, B * P), jnp.bfloat16),
        ],
        compiler_params=cparams,
    )(x, y2, st2, cvec(p['g3'], Cout, Co), cvec(p['b3'], Cout, Co),
      wmat(p['w3'], Cout, Cout, Co, Co), wsm, bsm)

    return out[:, :Cout].reshape(N, Cout, H, W)


def init_params(key, nfin, nfout):
    # Deterministic synthetic init (shapes match the PyTorch module; weights HWIO).
    ks = jax.random.split(key, 5)

    def conv_w(k, cin, cout, ksz):
        bound = 1.0 / np.sqrt(cin * ksz * ksz)
        return jax.random.uniform(k, (ksz, ksz, cin, cout), jnp.float32, -bound, bound)

    return {
        'g1': jnp.ones((1, nfin), jnp.float32), 'b1': jnp.zeros((1, nfin), jnp.float32),
        'w1': conv_w(ks[0], nfin, nfout, 3),
        'g2': jnp.ones((1, nfout), jnp.float32), 'b2': jnp.zeros((1, nfout), jnp.float32),
        'w2': conv_w(ks[1], nfout, nfout, 3),
        'g3': jnp.ones((1, nfout), jnp.float32), 'b3': jnp.zeros((1, nfout), jnp.float32),
        'w3': conv_w(ks[2], nfout, nfout, 3),
        'ws': conv_w(ks[3], nfin, nfout, 1).reshape(nfin, nfout),
        'bs': jax.random.uniform(ks[4], (1, nfout), jnp.float32,
                                 -1.0 / np.sqrt(nfin), 1.0 / np.sqrt(nfin)),
    }


def resblock_ref(x_nchw, p):
    # Pure-JAX reference (same math, XLA convolution) for a sanity check.
    x = jnp.transpose(x_nchw, (0, 2, 3, 1)).astype(jnp.float32)

    def bn_lrelu(v, g, b):
        m = jnp.mean(v, axis=(0, 1, 2), keepdims=True)
        var = jnp.mean((v - m) ** 2, axis=(0, 1, 2), keepdims=True)
        y = (v - m) / jnp.sqrt(var + EPS) * g.reshape(1, 1, 1, -1) + b.reshape(1, 1, 1, -1)
        return jnp.where(y > 0, y, NEG_SLOPE * y)

    def conv(v, w):
        return jax.lax.conv_general_dilated(
            v, w, (1, 1), ((1, 1), (1, 1)),
            dimension_numbers=('NHWC', 'HWIO', 'NHWC'),
            precision=jax.lax.Precision.HIGHEST)

    h = conv(bn_lrelu(x, p['g1'], p['b1']), p['w1'])
    h = conv(bn_lrelu(h, p['g2'], p['b2']), p['w2'])
    h = conv(bn_lrelu(h, p['g3'], p['b3']), p['w3'])
    skip = jnp.einsum('nhwc,cf->nhwf', x, p['ws'],
                      precision=jax.lax.Precision.HIGHEST) + p['bs'].reshape(1, 1, 1, -1)
    return jnp.transpose(skip + h, (0, 3, 1, 2))


if __name__ == "__main__":
    key = jax.random.PRNGKey(0)
    kx, kp = jax.random.split(key)
    N, Cin, H, W = 2, 4, 16, 16   # x is NCHW, as in PyTorch
    Cout = 8
    x = jax.random.normal(kx, (N, Cin, H, W), jnp.float32)
    params = init_params(kp, Cin, Cout)

    out = jax.block_until_ready(resblock_pallas(x, params))
    ref = jax.block_until_ready(resblock_ref(x, params))
    np.testing.assert_allclose(np.asarray(out), np.asarray(ref), rtol=5e-2, atol=5e-2)
    print("KERNEL_OK")
</pallas_src>

<mosaic_0001>
module attributes {stable_mosaic.version = 11 : i64} {
  func.func @kernel(%arg0: i32, %arg1: memref<1x8x256xf32, #tpu.memory_space<vmem>>, %arg2: memref<1x8x2xf32, #tpu.memory_space<vmem>>) attributes {dimension_semantics = [#tpu.dimension_semantics<parallel>], iteration_bounds = array<i64: 2>, scalar_prefetch = 0 : i64, scratch_operands = 0 : i64, tpu.core_type = #tpu.core_type<tc>, window_params = [{transform_indices = @transform_0, window_bounds = array<i64: 1, 8, 256>}, {transform_indices = @transform_1, window_bounds = array<i64: 1, 8, 2>}]} {
    %cst = arith.constant 0.000000e+00 : f32
    %0 = vector.broadcast %cst : f32 to vector<8x1xf32>
    %cst_0 = arith.constant 0.000000e+00 : f32
    %1 = vector.broadcast %cst_0 : f32 to vector<8x1xf32>
    %c0 = arith.constant 0 : index
    %c0_1 = arith.constant 0 : index
    %c0_2 = arith.constant 0 : index
    %2 = vector.load %arg1[%c0, %c0_1, %c0_2] : memref<1x8x256xf32, #tpu.memory_space<vmem>>, vector<1x8x256xf32>
    %3 = vector.shape_cast %2 : vector<1x8x256xf32> to vector<8x256xf32>
    %cst_3 = arith.constant dense<0.000000e+00> : vector<8xf32>
    %4 = vector.multi_reduction <add>, %3, %cst_3 [1] : vector<8x256xf32> to vector<8xf32>
    %5 = vector.shape_cast %4 : vector<8xf32> to vector<8x1xf32>
    %6 = arith.addf %0, %5 : vector<8x1xf32>
    %7 = arith.mulf %3, %3 : vector<8x256xf32>
    %cst_4 = arith.constant dense<0.000000e+00> : vector<8xf32>
    %8 = vector.multi_reduction <add>, %7, %cst_4 [1] : vector<8x256xf32> to vector<8xf32>
    %9 = vector.shape_cast %8 : vector<8xf32> to vector<8x1xf32>
    %10 = arith.addf %1, %9 : vector<8x1xf32>
    %c0_5 = arith.constant 0 : index
    %c0_6 = arith.constant 0 : index
    %c0_7 = arith.constant 0 : index
    %11 = vector.load %arg2[%c0_5, %c0_6, %c0_7] : memref<1x8x2xf32, #tpu.memory_space<vmem>>, vector<1x8x1xf32>
    %12 = vector.shape_cast %11 : vector<1x8x1xf32> to vector<8x1xf32>
    %13 = vector.shape_cast %6 : vector<8x1xf32> to vector<1x8x1xf32>
    tpu.vector_store %arg2[%c0_5, %c0_6, %c0_7], %13 {strides = array<i32>} : memref<1x8x2xf32, #tpu.memory_space<vmem>>, vector<1x8x1xf32>,
    %c0_8 = arith.constant 0 : index
    %c0_9 = arith.constant 0 : index
    %c1 = arith.constant 1 : index
    %14 = vector.load %arg2[%c0_8, %c0_9, %c1] : memref<1x8x2xf32, #tpu.memory_space<vmem>>, vector<1x8x1xf32>
    %15 = vector.shape_cast %14 : vector<1x8x1xf32> to vector<8x1xf32>
    %16 = vector.shape_cast %10 : vector<8x1xf32> to vector<1x8x1xf32>
    tpu.vector_store %arg2[%c0_8, %c0_9, %c1], %16 {strides = array<i32>} : memref<1x8x2xf32, #tpu.memory_space<vmem>>, vector<1x8x1xf32>,
    return
  }
  func.func @transform_0(%arg0: i32) -> (i32, i32, i32) {
    %c0_i32 = arith.constant 0 : i32
    %c0_i32_0 = arith.constant 0 : i32
    %c0_i32_1 = arith.constant 0 : i32
    return %arg0, %c0_i32, %c0_i32_0 : i32, i32, i32
  }
  func.func @transform_1(%arg0: i32) -> (i32, i32, i32) {
    %c0_i32 = arith.constant 0 : i32
    %c0_i32_0 = arith.constant 0 : i32
    %c0_i32_1 = arith.constant 0 : i32
    return %arg0, %c0_i32, %c0_i32_0 : i32, i32, i32
  }
}

</mosaic_0001>

<bundles_post_ra>
// kernel: tpu_custom_call.1
= control target key start
LH: loop header
LB: loop body
LE: loop exit
PB: predicated region body
PF: predicated region fallthrough
CT: control target
= control target key end

     0   :  { %6 = vsyncpa [#allocation3], 0  ;;  %s449_s0 = inlined_call_operand.hbm [shape: f32[2,8,256], index: 0, kind: input, shape index: {}]   ;;  %s450_s1 = inlined_call_operand.vmem [shape: f32[2,8,2], index: 1, kind: output, shape index: {}]  }
   0x1   :  { %8 = vsyncpa [#allocation3 + $0x1], 0  ;;  %s342_s6 = smov 0   ;;  %s344_s7 = smov 0  }
   0x2   :  { %s346_s8 = smov 0   ;;  %s348_s9 = smov 0  }
   0x3 LB: > { %s361_s10 = sadd.s32 4294967295, %s329_s9   ;;  %s364_s11 = sadd.s32 1, %s329_s9   ;;  %s329_s9 = sphi %s348_s9, %s458_s9   ;;  %s325_s8 = sphi %s346_s8, %s457_s8   ;;  %s321_s7 = sphi %s344_s7, %s456_s7   ;;  %s317_s6 = sphi %s342_s6, %s455_s6  }
   0x4   : > { %s18_s12 = ssub.s32 %s329_s9, %s364_s11  ;;  %s21_s13 = sadd.s32 1, %s325_s8 }
   0x5   : > { %p19_p0 = scmp.eq.s32.totalorder %s18_s12, 0  ;;  %p28_p1 = scmp.ne.s32.totalorder %s325_s8, %s321_s7 }
   0x6   : > { %p29_p2 = scmp.eq.s32.totalorder %s329_s9, 0  ;;  %p34_p3 = scmp.ne.s32.totalorder %s321_s7, %s317_s6 }
   0x7   : > { %s374_s14 = scalar_select %p19_p0, %s325_s8, %s21_s13  }
   0x8   : > { %p30_p4 = por %p29_p2, %p28_p1  ;;  %p35_p5 = scmp.eq.s32.totalorder %s361_s10, 0 }
   0x9   : > { %p232_p6 = scmp.lt.s32.totalorder %s329_s9, 2  ;;  %s84_s16 = sand.u32 1, %s325_s8  }
   0xa   : > { %p378_p7 = por %p35_p5, %p34_p3  ;;  %s217_s17 = sshll.u32 %s84_s16, 4 }
   0xb   : > { %s225_s18 = sshll.u32 %s329_s9, 8  ;;  %s88_s22 = scalar_lea.vmem [#allocation2], %s217_s17 }
   0xc   : > { %s387_s21 = scalar_lea.hbm %s449_s0, %s225_s18  ;;  %s96_s23 = sshll.u32 %s88_s22, 4  ;;  %s389_s23 = int_to_ptr.vmem [resolvable:$true] %s96_s23 }
   0xd   : > { %p391_p8 = pnand %p232_p6, %p30_p4  ;;  %s85_s25 = scalar_lea.sflag [#allocation3], %s84_s16 }
   0xe   : > { %s265_s26 = scalar_lea.hbm %s387_s21, 256  ;;  %s270_s29 = scalar_lea.hbm %s449_s0, 512 }
   0xf   : > { %p266_p11 = scmp.ne.s32.totalorder %s387_s21, %s265_s26  ;;  %p267_p12 = pneg %p391_p8 }
  0x10   : > { %p271_p1 = scmp.lt.u32.totalorder %s387_s21, %s449_s0  ;;  %p272_p2 = scmp.lt.u32.totalorder %s270_s29, %s265_s26 }
  0x11   : > { %p268_p13 = pnand %p267_p12, %p266_p11  ;;  %p274_p4 = scmp.lt.u32.totalorder %s265_s26, %s387_s21 }
  0x12   : > { %p273_p3 = por %p272_p2, %p271_p1 }
  0x13   : > { %p269_p0 = pneg %p268_p13 }
  0x14   : > { %p275_p5 = por %p274_p4, %p273_p3 }
  0x16   : > { %p276_p6 = pnand %p275_p5, %p269_p0 }
  0x18   : > { %279 = shalt.err (!%p276_p6)
}
  0x19   : > { %s280_s3 = scalar_lea.vmem %s389_s23, 256  ;;  %s331_s4 = smov [#allocation2]  }
  0x1a   : > { %p281_p11 = scmp.ne.s32.totalorder %s389_s23, %s280_s3  ;;  %s285_s5 = sshll.u32 %s331_s4, 4  ;;  %s286_s5 = int_to_ptr.vmem [resolvable:$false] %s285_s5 }
  0x1b   : > { %s287_s6 = scalar_lea.vmem %s286_s5, 512  ;;  %p288_p10 = scmp.lt.s32.totalorder %s389_s23, %s286_s5 }
  0x1c   : > { %p283_p13 = pnand %p281_p11, %p267_p12  ;;  %p289_p1 = scmp.lt.s32.totalorder %s287_s6, %s280_s3 }
  0x1e   : > { %p284_p9 = pneg %p283_p13  ;;  %p290_p2 = por %p289_p1, %p288_p10 }
  0x20   : > { %p291_p3 = pnand %p290_p2, %p284_p9 }
  0x22   : > { %294 = shalt.err (!%p291_p3)
}
  0x23   : > { %231 = dma.hbm_to_vmem [thread:$0]  (!%p391_p8), %s387_s21, 256, %s389_s23, %s85_s25  }
  0x24   : > { %p453_p0 = scmp.lt.s32.totalorder %s329_s9, 3  ;;  %p454_p4 = scmp.ge.s32.totalorder %s329_s9, 1 }
  0x26   : > { %p102_p12 = pnand %p454_p4, %p453_p0 }
  0x27   : > { %s107_s12 = sand.u32 (!%p102_p12), 1, %s321_s7  }
  0x28   : > { %105 = sbr.rel (%p102_p12) target bundleno = 198 (0xc6), region = 24  ;;  %s221_s13 = sshll.u32 (!%p102_p12), %s107_s12, 4 }
  0x29   : > { %s108_s16 = scalar_lea.sflag (!%p102_p12), [#allocation3], %s107_s12  ;;  %s111_s17 = scalar_lea.vmem (!%p102_p12), [#allocation2], %s221_s13 }
  0x2f   : > { %312 = dma.done.wait (%p378_p7), %s108_s16, 256  }
  0x30   : > { %314 = vsyncadd (%p378_p7), %s108_s16, 4294967040  ;;  %v133_v0 = vld [vmem:[%s111_s17] sm:$0xff]  ;;  %v134_v1 = vld [vmem:[%s111_s17 + $0x8] sm:$0xff]  ;;  %p129_p8 = scmp.lt.s32.totalorder %s361_s10, 1  ;;  %vm145_vm0 = vcmask 7168   ;;  %vm147_vm1 = vcmask 15368  }
  0x31   : > { %v135_v2 = vadd.f32 %v134_v1, %v133_v0  ;;  %v139_v3 = vmul.f32 %v133_v0, %v133_v0  ;;  %v140_v4 = vmul.f32 %v134_v1, %v134_v1 }
  0x32   : > { %s460_s10 = smov (!%p129_p8, %s361_s10), 1 }
  0x33   : > { %136 = vadd.xlane.f32.xlu0 %v135_v2  ;;  %v141_v5 = vadd.f32 %v140_v4, %v139_v3  ;;  %s222_s9 = sshll.u32 %s460_s10, 3 }
  0x34   : > { %s132_s20 = scalar_lea.vmem %s450_s1, %s222_s9 }
  0x37   : > { %142 = vadd.xlane.f32.xlu0 %v141_v5 }
  0xc0   : > { %v137_v6 = vpop.xlane.xlu0 %136 }
  0xc1   : > { %146 = vst.msk [vmem:[%s132_s20] sm:$0xff] %vm145_vm0, %v137_v6 }
  0xc4   : > { %v143_v7 = vpop.xlane.xlu0 %142 }
  0xc5   : > { %148 = vst.msk [vmem:[%s132_s20] sm:$0xff] %vm147_vm1, %v143_v7 }
  0xc6 PF: > { %p11_p7 = scmp.ge.s32.totalorder %s364_s11, 4   ;;  %s455_s6 = smov %s321_s7 }
  0xc7   : > { %s456_s7 = smov %s325_s8  ;;  %s457_s8 = smov %s374_s14 }
  0xc8   : > { %s458_s9 = smov %s364_s11  ;;  %13 = sbr.rel (!%p11_p7) target bundleno = 3 (0x3), region = 64 }
  0xcf   :  { %168 = vsyncpa [#allocation3], 1 }
  0xd0   :  { %170 = vsyncpa [#allocation3 + $0x1], 1 }

</bundles_post_ra>
